<compile_context>
chip_gen: v7x
topology: tpu7x:2x2x1
jax: 0.10.0
libtpu: 0.0.40
codegen_flags: <defaults>
</compile_context>

<pallas_src>
import functools
import math

import jax
import jax.numpy as jnp
from jax.experimental import pallas as pl


def _round_up(x, m):
    return ((x + m - 1) // m) * m


def _fcn_fused_kernel(*refs, num_linear_layers):
    """Fused MLP forward: (Linear -> ReLU)*L_hidden -> Linear, one body.

    refs = (x_ref, w0, b0, w1, b1, ..., w_out, b_out, o_ref).
    All operands are lane-dense (last dim a multiple of 128).  Matmuls run on
    the MXU with f32 accumulation; bias add / ReLU stay in f32 (v5e has no
    bf16 VPU).  The activation never leaves VMEM between layers.
    """
    x_ref = refs[0]
    o_ref = refs[-1]
    wb = refs[1:-1]

    h = x_ref[...]  # f32 tile, loaded once; no redundant astype
    for i in range(num_linear_layers):
        w = wb[2 * i][...]        # bf16 [K_pad, N_pad], lane-dense
        b = wb[2 * i + 1][...]    # f32  (1, N_pad), pre-shaped at init
        # Single cast per layer (f32 -> bf16) feeding the MXU; f32 accumulate.
        h = jnp.dot(h.astype(w.dtype), w, preferred_element_type=jnp.float32) + b
        if i < num_linear_layers - 1:
            h = jnp.maximum(h, 0.0)  # ReLU on hidden layers only
            # dropout: identity (eval mode)
    o_ref[...] = h.astype(o_ref.dtype)


def fcn_forward_pallas(x, layer_params, num_classes):
    """Run the whole FCN forward as a single pallas_call.

    x: [B, ...] (flattened to [B, features]; features zero-padded to the
    first layer's padded K if needed).
    layer_params: tuple of (w, b); w is [K_pad, N_pad] bf16 (zero-padded to
    128-lane multiples), b is (1, N_pad) f32.
    """
    batch = x.shape[0]
    x = x.reshape(batch, -1).astype(jnp.float32)

    # Pad batch to a multiple of 8 f32 sublanes -> whole-vreg tiles, unmasked
    # stores.  Pad features to the first layer's (zero-padded) K.
    batch_pad = max(8, _round_up(batch, 8))
    in_feat_pad = layer_params[0][0].shape[0]
    pad_rows = batch_pad - batch
    pad_cols = in_feat_pad - x.shape[1]
    if pad_rows or pad_cols:
        x = jnp.pad(x, ((0, pad_rows), (0, max(0, pad_cols))))

    num_linear_layers = len(layer_params)
    out_cols_pad = layer_params[-1][0].shape[1]

    operands = [x]
    in_specs = [pl.BlockSpec(x.shape, lambda: (0, 0))]
    flops = 0
    bytes_accessed = x.size * x.dtype.itemsize
    for w, b in layer_params:
        operands += [w, b]
        in_specs += [
            pl.BlockSpec(w.shape, lambda: (0, 0)),
            pl.BlockSpec(b.shape, lambda: (0, 0)),
        ]
        flops += 2 * batch_pad * w.shape[0] * w.shape[1]
        bytes_accessed += w.size * w.dtype.itemsize + b.size * b.dtype.itemsize
    bytes_accessed += batch_pad * out_cols_pad * 4  # output writeback

    kernel = functools.partial(_fcn_fused_kernel, num_linear_layers=num_linear_layers)

    # All operands are single full-extent VMEM blocks (< 0.5 MiB total at
    # these shapes), so no grid is needed; see scaling TODO at file top.
    out = pl.pallas_call(
        kernel,
        out_shape=jax.ShapeDtypeStruct((batch_pad, out_cols_pad), jnp.float32),
        in_specs=in_specs,
        out_specs=pl.BlockSpec((batch_pad, out_cols_pad), lambda: (0, 0)),
        cost_estimate=pl.CostEstimate(
            flops=flops, transcendentals=0, bytes_accessed=bytes_accessed
        ),
    )(*operands)

    # Strip batch / lane padding.  NOTE: padded logit columns are exactly 0 —
    # slice BEFORE any softmax/argmax downstream (done here).
    return out[:batch, :num_classes]


def init_linear_params(key, in_features, out_features, *, param_dtype=jnp.bfloat16,
                       pad_in_to=None, pad_out_to=None):
    """nn.Linear default init U(-1/sqrt(in), 1/sqrt(in)).

    Weight stored as (in, out) so the kernel computes x @ W (== PyTorch x @ W.T).
    Weights cast to `param_dtype` (bf16: halves weight DMA, native MXU path);
    bias stays f32 and is pre-shaped to (1, out_pad).  Rows are zero-padded to
    `pad_in_to` and columns/bias to `pad_out_to` (128-lane multiples) so the
    kernel only ever sees lane-dense tiles; the zero padding is exact.
    """
    k_w, k_b = jax.random.split(key)
    bound = 1.0 / math.sqrt(in_features)
    w = jax.random.uniform(
        k_w, (in_features, out_features), dtype=jnp.float32, minval=-bound, maxval=bound
    )
    b = jax.random.uniform(
        k_b, (out_features,), dtype=jnp.float32, minval=-bound, maxval=bound
    )
    row_pad = (pad_in_to - in_features) if (pad_in_to and pad_in_to > in_features) else 0
    col_pad = (pad_out_to - out_features) if (pad_out_to and pad_out_to > out_features) else 0
    if row_pad or col_pad:
        w = jnp.pad(w, ((0, row_pad), (0, col_pad)))
    if col_pad:
        b = jnp.pad(b, (0, col_pad))
    return w.astype(param_dtype), b.reshape(1, -1)


class FCNModelPallas:
    def __init__(self, input_size, hidden_size, num_classes, dropout_rate,
                 num_hidden_layers, key, param_dtype=jnp.bfloat16):
        self.num_hidden_layers = num_hidden_layers
        self.num_classes = num_classes
        self.dropout_rate = dropout_rate  # identity in eval mode
        keys = jax.random.split(key, num_hidden_layers + 1)

        in_pad = _round_up(input_size, 128)
        hidden_pad = _round_up(hidden_size, 128)
        out_pad = _round_up(num_classes, 128)

        params = [init_linear_params(keys[0], input_size, hidden_size,
                                     param_dtype=param_dtype,
                                     pad_in_to=in_pad, pad_out_to=hidden_pad)]
        for i in range(1, num_hidden_layers):
            params.append(init_linear_params(keys[i], hidden_size, hidden_size,
                                             param_dtype=param_dtype,
                                             pad_in_to=hidden_pad,
                                             pad_out_to=hidden_pad))
        params.append(init_linear_params(keys[-1], hidden_size, num_classes,
                                         param_dtype=param_dtype,
                                         pad_in_to=hidden_pad,
                                         pad_out_to=out_pad))
        self.params = tuple(params)
        # One jitted executable wrapping the single fused pallas_call.
        self._forward = jax.jit(
            functools.partial(fcn_forward_pallas, num_classes=num_classes)
        )

    def __call__(self, x):
        # x: NCHW [B, C, H, W] (or already flat) -> logits [B, num_classes]
        return self._forward(x, self.params)


def _reference_forward(x, layer_params, num_classes):
    """Plain-JAX reference using the same (padded, bf16) params as the kernel."""
    b = x.shape[0]
    h = x.reshape(b, -1).astype(jnp.float32)
    in_pad = layer_params[0][0].shape[0]
    if h.shape[1] < in_pad:
        h = jnp.pad(h, ((0, 0), (0, in_pad - h.shape[1])))
    for i, (w, bias) in enumerate(layer_params):
        h = jnp.dot(h.astype(w.dtype), w, preferred_element_type=jnp.float32) + bias
        if i < len(layer_params) - 1:
            h = jnp.maximum(h, 0.0)
    return h[:, :num_classes]


if __name__ == "__main__":
    key = jax.random.PRNGKey(0)
    k_params, k_input = jax.random.split(key)

    # Small shapes consistent with the module: NCHW image input, flattened.
    batch, channels, height, width = 2, 4, 16, 16
    input_size = channels * height * width  # 1024
    hidden_size = 32
    num_classes = 10
    num_hidden_layers = 3
    dropout_rate = 0.5  # identity at inference

    model = FCNModelPallas(
        input_size, hidden_size, num_classes, dropout_rate, num_hidden_layers,
        key=k_params,
    )

    x = jax.random.normal(k_input, (batch, channels, height, width), dtype=jnp.float32)

    out = jax.block_until_ready(model(x))
    assert out.shape == (batch, num_classes), out.shape
    assert bool(jnp.all(jnp.isfinite(out)))

    ref = _reference_forward(x, model.params, num_classes)
    assert bool(jnp.allclose(out, ref, rtol=1e-2, atol=1e-2)), (out, ref)

    print("KERNEL_OK")
</pallas_src>

<mosaic_0001>
module attributes {stable_mosaic.version = 11 : i64} {
  func.func @_fcn_fused_kernel(%arg0: memref<8x1024xf32, #tpu.memory_space<vmem>>, %arg1: memref<1024x128xbf16, #tpu.memory_space<vmem>>, %arg2: memref<1x128xf32, #tpu.memory_space<vmem>>, %arg3: memref<128x128xbf16, #tpu.memory_space<vmem>>, %arg4: memref<1x128xf32, #tpu.memory_space<vmem>>, %arg5: memref<128x128xbf16, #tpu.memory_space<vmem>>, %arg6: memref<1x128xf32, #tpu.memory_space<vmem>>, %arg7: memref<128x128xbf16, #tpu.memory_space<vmem>>, %arg8: memref<1x128xf32, #tpu.memory_space<vmem>>, %arg9: memref<8x128xf32, #tpu.memory_space<vmem>>) attributes {dimension_semantics = [], scalar_prefetch = 0 : i64, scratch_operands = 0 : i64, tpu.core_type = #tpu.core_type<tc>} {
    %c0 = arith.constant 0 : index
    %c0_0 = arith.constant 0 : index
    %0 = vector.load %arg0[%c0, %c0_0] : memref<8x1024xf32, #tpu.memory_space<vmem>>, vector<8x1024xf32>
    %c0_1 = arith.constant 0 : index
    %c0_2 = arith.constant 0 : index
    %1 = vector.load %arg1[%c0_1, %c0_2] : memref<1024x128xbf16, #tpu.memory_space<vmem>>, vector<1024x128xbf16>
    %c0_3 = arith.constant 0 : index
    %c0_4 = arith.constant 0 : index
    %2 = vector.load %arg2[%c0_3, %c0_4] : memref<1x128xf32, #tpu.memory_space<vmem>>, vector<1x128xf32>
    %3 = arith.truncf %0 : vector<8x1024xf32> to vector<8x1024xbf16>
    %cst = arith.constant dense<0.000000e+00> : vector<8x128xf32>
    %4 = tpu.matmul %3, %1, %cst {dimension_numbers = #tpu.dot_dimension_numbers<[1], [0], [0], [1], [0, 0, 1, 1], [], []>} : vector<8x1024xbf16>, vector<1024x128xbf16>, vector<8x128xf32> -> vector<8x128xf32>
    %5 = vector.broadcast %2 : vector<1x128xf32> to vector<8x128xf32>
    %6 = arith.addf %4, %5 : vector<8x128xf32>
    %cst_5 = arith.constant 0.000000e+00 : f32
    %7 = vector.broadcast %cst_5 : f32 to vector<8x128xf32>
    %8 = arith.maximumf %6, %7 : vector<8x128xf32>
    %c0_6 = arith.constant 0 : index
    %c0_7 = arith.constant 0 : index
    %9 = vector.load %arg3[%c0_6, %c0_7] : memref<128x128xbf16, #tpu.memory_space<vmem>>, vector<128x128xbf16>
    %c0_8 = arith.constant 0 : index
    %c0_9 = arith.constant 0 : index
    %10 = vector.load %arg4[%c0_8, %c0_9] : memref<1x128xf32, #tpu.memory_space<vmem>>, vector<1x128xf32>
    %11 = arith.truncf %8 : vector<8x128xf32> to vector<8x128xbf16>
    %cst_10 = arith.constant dense<0.000000e+00> : vector<8x128xf32>
    %12 = tpu.matmul %11, %9, %cst_10 {dimension_numbers = #tpu.dot_dimension_numbers<[1], [0], [0], [1], [0, 0, 1, 1], [], []>} : vector<8x128xbf16>, vector<128x128xbf16>, vector<8x128xf32> -> vector<8x128xf32>
    %13 = vector.broadcast %10 : vector<1x128xf32> to vector<8x128xf32>
    %14 = arith.addf %12, %13 : vector<8x128xf32>
    %cst_11 = arith.constant 0.000000e+00 : f32
    %15 = vector.broadcast %cst_11 : f32 to vector<8x128xf32>
    %16 = arith.maximumf %14, %15 : vector<8x128xf32>
    %c0_12 = arith.constant 0 : index
    %c0_13 = arith.constant 0 : index
    %17 = vector.load %arg5[%c0_12, %c0_13] : memref<128x128xbf16, #tpu.memory_space<vmem>>, vector<128x128xbf16>
    %c0_14 = arith.constant 0 : index
    %c0_15 = arith.constant 0 : index
    %18 = vector.load %arg6[%c0_14, %c0_15] : memref<1x128xf32, #tpu.memory_space<vmem>>, vector<1x128xf32>
    %19 = arith.truncf %16 : vector<8x128xf32> to vector<8x128xbf16>
    %cst_16 = arith.constant dense<0.000000e+00> : vector<8x128xf32>
    %20 = tpu.matmul %19, %17, %cst_16 {dimension_numbers = #tpu.dot_dimension_numbers<[1], [0], [0], [1], [0, 0, 1, 1], [], []>} : vector<8x128xbf16>, vector<128x128xbf16>, vector<8x128xf32> -> vector<8x128xf32>
    %21 = vector.broadcast %18 : vector<1x128xf32> to vector<8x128xf32>
    %22 = arith.addf %20, %21 : vector<8x128xf32>
    %cst_17 = arith.constant 0.000000e+00 : f32
    %23 = vector.broadcast %cst_17 : f32 to vector<8x128xf32>
    %24 = arith.maximumf %22, %23 : vector<8x128xf32>
    %c0_18 = arith.constant 0 : index
    %c0_19 = arith.constant 0 : index
    %25 = vector.load %arg7[%c0_18, %c0_19] : memref<128x128xbf16, #tpu.memory_space<vmem>>, vector<128x128xbf16>
    %c0_20 = arith.constant 0 : index
    %c0_21 = arith.constant 0 : index
    %26 = vector.load %arg8[%c0_20, %c0_21] : memref<1x128xf32, #tpu.memory_space<vmem>>, vector<1x128xf32>
    %27 = arith.truncf %24 : vector<8x128xf32> to vector<8x128xbf16>
    %cst_22 = arith.constant dense<0.000000e+00> : vector<8x128xf32>
    %28 = tpu.matmul %27, %25, %cst_22 {dimension_numbers = #tpu.dot_dimension_numbers<[1], [0], [0], [1], [0, 0, 1, 1], [], []>} : vector<8x128xbf16>, vector<128x128xbf16>, vector<8x128xf32> -> vector<8x128xf32>
    %29 = vector.broadcast %26 : vector<1x128xf32> to vector<8x128xf32>
    %30 = arith.addf %28, %29 : vector<8x128xf32>
    %c0_23 = arith.constant 0 : index
    %c0_24 = arith.constant 0 : index
    %31 = vector.load %arg9[%c0_23, %c0_24] : memref<8x128xf32, #tpu.memory_space<vmem>>, vector<8x128xf32>
    tpu.vector_store %arg9[%c0_23, %c0_24], %30 {strides = array<i32>} : memref<8x128xf32, #tpu.memory_space<vmem>>, vector<8x128xf32>,
    return
  }
}

</mosaic_0001>

<bundles_post_ra>
// kernel: fcn_forward_pallas.1
= control target key start
LH: loop header
LB: loop body
LE: loop exit
PB: predicated region body
PF: predicated region fallthrough
CT: control target
= control target key end

     0   :  { %14 = vsyncpa [#allocation3], 0  ;;  %s1471_s30 = smov [#allocation2]   ;;  %s1679_s0 = inlined_call_operand.vmem [shape: f32[8,1024], index: 0, kind: input, shape index: {}]   ;;  %s1680_s1 = inlined_call_operand.hbm [shape: bf16[1024,128], index: 1, kind: input, shape index: {}]   ;;  %s1681_s2 = inlined_call_operand.vmem [shape: f32[1,128], index: 2, kind: input, shape index: {}]   ;;  %s1682_s3 = inlined_call_operand.vmem [shape: bf16[128,128], index: 3, kind: input, shape index: {}]   ;;  %s1683_s4 = inlined_call_operand.vmem [shape: f32[1,128], index: 4, kind: input, shape index: {}]   ;;  %s1684_s5 = inlined_call_operand.vmem [shape: bf16[128,128], index: 5, kind: input, shape index: {}]   ;;  %s1685_s6 = inlined_call_operand.vmem [shape: f32[1,128], index: 6, kind: input, shape index: {}]   ;;  %s1686_s7 = inlined_call_operand.vmem [shape: bf16[128,128], index: 7, kind: input, shape index: {}]   ;;  %s1687_s8 = inlined_call_operand.vmem [shape: f32[1,128], index: 8, kind: input, shape index: {}]   ;;  %s1688_s9 = inlined_call_operand.vmem [shape: f32[8,128], index: 9, kind: output, shape index: {}]  }
   0x1   :  { %s22_s10 = sshll.u32 %s1471_s30, 4  ;;  %s1447_s13 = scalar_lea.hbm %s1680_s1, 8192  ;;  %s23_s10 = int_to_ptr.vmem [resolvable:$true] %s22_s10 }
   0x2   :  { %p1448_p0 = scmp.ne.s32.totalorder %s1680_s1, %s1447_s13  ;;  %p1451_p1 = scmp.lt.u32.totalorder %s1447_s13, %s1680_s1 }
   0x4   :  { %p1453_p2 = pnand %p1451_p1, %p1448_p0 }
   0x6   :  { %1456 = shalt.err (!%p1453_p2)
}
   0x7   :  { %s1457_s18 = scalar_lea.vmem %s23_s10, 8192  ;;  %p1462_p4 = scmp.lt.s32.totalorder %s23_s10, %s23_s10 }
   0x8   :  { %p1458_p3 = scmp.ne.s32.totalorder %s23_s10, %s1457_s18  ;;  %p1463_p5 = scmp.lt.s32.totalorder %s1457_s18, %s1457_s18 }
   0xa   :  { %p1464_p6 = por %p1463_p5, %p1462_p4 }
   0xc   :  { %p1465_p7 = pnand %p1464_p6, %p1458_p3 }
   0xe   :  { %1468 = shalt.err (!%p1465_p7)
}
   0xf   :  { %s1472_s19 = smov 64   ;;  %s1473_s20 = smov 4  }
  0x10   :  { %28 = dma.hbm_to_vmem [thread:$0]  %s1680_s1, 8192, %s23_s10, [#allocation3], %s1472_s19, %s1472_s19, %s1473_s20  }
  0x11   :  { %1469 = dma.done.wait [#allocation3], 8192  }
  0x12   :  { %1470 = vsyncadd [#allocation3], 4294959104  ;;  %v1359_v0 = vld [vmem:[#allocation2 + $0x40] sm:$0xff]   ;;  %v1363_v4 = vld [vmem:[#allocation2 + $0x48] sm:$0xff]   ;;  %vm1475_vm0 = vmmov 0  }
  0x13   :  { %v1360_v1 = vld [vmem:[#allocation2 + $0xc0] sm:$0xff]   ;;  %1179 = vmatprep.subr.bf16.mxu0 %v1359_v0  ;;  %v1364_v5 = vld [vmem:[#allocation2 + $0xc8] sm:$0xff]   ;;  %v1367_v8 = vld [vmem:[#allocation2 + $0x50] sm:$0xff]  }
  0x14   :  { %v1361_v2 = vld [vmem:[#allocation2] sm:$0xff]   ;;  %1201 = vmatprep.subr.bf16.mxu1 %v1360_v1  ;;  %v1365_v6 = vld [vmem:[#allocation2 + $0x8] sm:$0xff]   ;;  %v1368_v9 = vld [vmem:[#allocation2 + $0xd0] sm:$0xff]  }
  0x15   :  { %v1362_v3 = vld [vmem:[#allocation2 + $0x80] sm:$0xff]   ;;  %1180 = vmatpush3.bf16.msra.mxu0 %v1361_v2  ;;  %v1366_v7 = vld [vmem:[#allocation2 + $0x88] sm:$0xff]   ;;  %v1369_v10 = vld [vmem:[#allocation2 + $0x10] sm:$0xff]  }
  0x16   :  { %1202 = vmatpush3.bf16.msra.mxu1 %v1362_v3  ;;  %1181 = vmatprep.subr.bf16.mxu0 %v1363_v4  ;;  %v1370_v11 = vld [vmem:[#allocation2 + $0x90] sm:$0xff]   ;;  %v1371_v12 = vld [vmem:[#allocation2 + $0x58] sm:$0xff]   ;;  %v1375_v16 = vld [vmem:[#allocation2 + $0x60] sm:$0xff]  }
  0x17   :  { %1203 = vmatprep.subr.bf16.mxu1 %v1364_v5  ;;  %v1372_v13 = vld [vmem:[#allocation2 + $0xd8] sm:$0xff]   ;;  %v1376_v17 = vld [vmem:[#allocation2 + $0xe0] sm:$0xff]   ;;  %v1379_v20 = vld [vmem:[#allocation2 + $0x68] sm:$0xff]  }
  0x18   :  { %v1373_v14 = vld [vmem:[#allocation2 + $0x18] sm:$0xff]   ;;  %v1377_v18 = vld [vmem:[#allocation2 + $0x20] sm:$0xff]   ;;  %v1380_v21 = vld [vmem:[#allocation2 + $0xe8] sm:$0xff]  }
  0x19   :  { %1182 = vmatpush3.bf16.msra.mxu0 %v1365_v6  ;;  %v1374_v15 = vld [vmem:[#allocation2 + $0x98] sm:$0xff]   ;;  %v1378_v19 = vld [vmem:[#allocation2 + $0xa0] sm:$0xff]   ;;  %v1381_v22 = vld [vmem:[#allocation2 + $0x28] sm:$0xff]  }
  0x1a   :  { %1204 = vmatpush3.bf16.msra.mxu1 %v1366_v7  ;;  %1183 = vmatprep.subr.bf16.mxu0 %v1367_v8  ;;  %v1382_v23 = vld [vmem:[#allocation2 + $0xa8] sm:$0xff]   ;;  %v1383_v24 = vld [vmem:[#allocation2 + $0x70] sm:$0xff]   ;;  %v1387_v28 = vld [vmem:[#allocation2 + $0x78] sm:$0xff]  }
  0x1b   :  { %1205 = vmatprep.subr.bf16.mxu1 %v1368_v9  ;;  %v1384_v25 = vld [vmem:[#allocation2 + $0xf0] sm:$0xff]   ;;  %v1388_v29 = vld [vmem:[#allocation2 + $0xf8] sm:$0xff]   ;;  %v48_v32 = vld [vmem:[%s1679_s0 + $0x8] sm:$0xff] }
  0x1c   :  { %v1385_v26 = vld [vmem:[#allocation2 + $0x30] sm:$0xff]   ;;  %v1389_v30 = vld [vmem:[#allocation2 + $0x38] sm:$0xff]   ;;  %v47_v34 = vld [vmem:[%s1679_s0] sm:$0xff]  ;;  %v185_v35 = vpack.c.bf16 %v48_v32, %v48_v32 }
  0x1d   :  { %1184 = vmatpush3.bf16.msra.mxu0 %v1369_v10  ;;  %v1386_v27 = vld [vmem:[#allocation2 + $0xb0] sm:$0xff]   ;;  %v1390_v31 = vld [vmem:[#allocation2 + $0xb8] sm:$0xff]   ;;  %v184_v37 = vpack.c.bf16 %v47_v34, %v47_v34  ;;  %v1391_v40 = vld [vmem:[#allocation2 + $0x140] sm:$0xff]  }
  0x1e   :  { %1206 = vmatpush3.bf16.msra.mxu1 %v1370_v11  ;;  %1185 = vmatprep.subr.bf16.mxu0 %v1371_v12  ;;  %v50_v33 = vld [vmem:[%s1679_s0 + $0x18] sm:$0xff]  ;;  %v49_v38 = vld [vmem:[%s1679_s0 + $0x10] sm:$0xff]  ;;  %v1392_v41 = vld [vmem:[#allocation2 + $0x1c0] sm:$0xff]  }
  0x1f   :  { %1207 = vmatprep.subr.bf16.mxu1 %v1372_v13  ;;  %v187_v36 = vpack.c.bf16 %v50_v33, %v50_v33  ;;  %v186_v39 = vpack.c.bf16 %v49_v38, %v49_v38  ;;  %614 = vmatprep.mubr.bf16.mxu0 %v185_v35  ;;  %v1393_v42 = vld [vmem:[#allocation2 + $0x100] sm:$0xff]   ;;  %v1395_v44 = vld [vmem:[#allocation2 + $0x148] sm:$0xff]   ;;  %v1399_v48 = vld [vmem:[#allocation2 + $0x150] sm:$0xff]  }
  0x20   :  { %v1394_v43 = vld [vmem:[#allocation2 + $0x180] sm:$0xff]   ;;  %v1396_v45 = vld [vmem:[#allocation2 + $0x1c8] sm:$0xff]   ;;  %v1400_v49 = vld [vmem:[#allocation2 + $0x1d0] sm:$0xff]  }
  0x21   :  { %1186 = vmatpush3.bf16.msra.mxu0 %v1373_v14  ;;  %654 = vmatprep.mubr.bf16.mxu1 %v187_v36  ;;  %v1397_v46 = vld [vmem:[#allocation2 + $0x108] sm:$0xff]   ;;  %v1401_v50 = vld [vmem:[#allocation2 + $0x110] sm:$0xff]   ;;  %v1403_v52 = vld [vmem:[#allocation2 + $0x158] sm:$0xff]  }
  0x22   :  { %1208 = vmatpush3.bf16.msra.mxu1 %v1374_v15  ;;  %1187 = vmatprep.subr.bf16.mxu0 %v1375_v16  ;;  %v1398_v47 = vld [vmem:[#allocation2 + $0x188] sm:$0xff]   ;;  %v1402_v51 = vld [vmem:[#allocation2 + $0x190] sm:$0xff]   ;;  %v1404_v53 = vld [vmem:[#allocation2 + $0x1d8] sm:$0xff]  }
  0x23   :  { %1209 = vmatprep.subr.bf16.mxu1 %v1376_v17  ;;  %v1405_v54 = vld [vmem:[#allocation2 + $0x118] sm:$0xff]   ;;  %v1407_v56 = vld [vmem:[#allocation2 + $0x160] sm:$0xff]   ;;  %v1411_v60 = vld [vmem:[#allocation2 + $0x168] sm:$0xff]   ;;  %v1474_v17 = vmov 0.0  }
  0x24   :  { %v1406_v55 = vld [vmem:[#allocation2 + $0x198] sm:$0xff]   ;;  %v1408_v57 = vld [vmem:[#allocation2 + $0x1e0] sm:$0xff]   ;;  %v1412_v61 = vld [vmem:[#allocation2 + $0x1e8] sm:$0xff]  }
  0x25   :  { %1188 = vmatpush3.bf16.msra.mxu0 %v1377_v18  ;;  %v1409_v58 = vld [vmem:[#allocation2 + $0x120] sm:$0xff]   ;;  %v1413_v62 = vld [vmem:[#allocation2 + $0x128] sm:$0xff]   ;;  %v1415_v0 = vld [vmem:[#allocation2 + $0x170] sm:$0xff]  }
  0x26   :  { %1210 = vmatpush3.bf16.msra.mxu1 %v1378_v19  ;;  %1189 = vmatprep.subr.bf16.mxu0 %v1379_v20  ;;  %v1410_v59 = vld [vmem:[#allocation2 + $0x1a0] sm:$0xff]   ;;  %v1414_v63 = vld [vmem:[#allocation2 + $0x1a8] sm:$0xff]   ;;  %v1416_v1 = vld [vmem:[#allocation2 + $0x1f0] sm:$0xff]  }
  0x27   :  { %1211 = vmatprep.subr.bf16.mxu1 %v1380_v21  ;;  %v1417_v2 = vld [vmem:[#allocation2 + $0x130] sm:$0xff]   ;;  %v1419_v4 = vld [vmem:[#allocation2 + $0x178] sm:$0xff]   ;;  %v52_v8 = vld [vmem:[%s1679_s0 + $0x28] sm:$0xff] }
  0x28   :  { %v1418_v3 = vld [vmem:[#allocation2 + $0x1b0] sm:$0xff]   ;;  %v1420_v5 = vld [vmem:[#allocation2 + $0x1f8] sm:$0xff]   ;;  %v189_v10 = vpack.c.bf16 %v52_v8, %v52_v8  ;;  %v51_v12 = vld [vmem:[%s1679_s0 + $0x20] sm:$0xff] }
  0x29   :  { %1190 = vmatpush3.bf16.msra.mxu0 %v1381_v22  ;;  %v1421_v6 = vld [vmem:[#allocation2 + $0x138] sm:$0xff]   ;;  %v53_v13 = vld [vmem:[%s1679_s0 + $0x30] sm:$0xff]  ;;  %v188_v14 = vpack.c.bf16 %v51_v12, %v51_v12  ;;  %v1423_v16 = vld [vmem:[%s1682_s3] sm:$0xff]  }
  0x2a   :  { %1212 = vmatpush3.bf16.msra.mxu1 %v1382_v23  ;;  %1191 = vmatprep.subr.bf16.mxu0 %v1383_v24  ;;  %v1422_v7 = vld [vmem:[#allocation2 + $0x1b8] sm:$0xff]   ;;  %v190_v15 = vpack.c.bf16 %v53_v13, %v53_v13  ;;  %v1424_v18 = vld [vmem:[%s1682_s3 + $0x8] sm:$0xff]   ;;  %v1425_v19 = vld [vmem:[%s1682_s3 + $0x10] sm:$0xff]  }
  0x2b   :  { %1213 = vmatprep.subr.bf16.mxu1 %v1384_v25  ;;  %v54_v9 = vld [vmem:[%s1679_s0 + $0x38] sm:$0xff]  ;;  %v1427_v21 = vld [vmem:[%s1682_s3 + $0x20] sm:$0xff]   ;;  %v1428_v22 = vld [vmem:[%s1682_s3 + $0x28] sm:$0xff]  }
  0x2c   :  { %v191_v11 = vpack.c.bf16 %v54_v9, %v54_v9  ;;  %v1426_v20 = vld [vmem:[%s1682_s3 + $0x18] sm:$0xff]   ;;  %v1429_v23 = vld [vmem:[%s1682_s3 + $0x30] sm:$0xff]   ;;  %v1431_v25 = vld [vmem:[%s1684_s5] sm:$0xff]  }
  0x2d   :  { %1192 = vmatpush3.bf16.msra.mxu0 %v1385_v26  ;;  %v1430_v24 = vld [vmem:[%s1682_s3 + $0x38] sm:$0xff]   ;;  %v1432_v26 = vld [vmem:[%s1684_s5 + $0x8] sm:$0xff]   ;;  %v1087_v33 = vld [vmem:[%s1681_s2] ss:$0 sm:$0xff] }
  0x2e   :  { %1214 = vmatpush3.bf16.msra.mxu1 %v1386_v27  ;;  %1193 = vmatprep.subr.bf16.mxu0 %v1387_v28  ;;  %v1433_v27 = vld [vmem:[%s1684_s5 + $0x10] sm:$0xff]   ;;  %v1434_v28 = vld [vmem:[%s1684_s5 + $0x18] sm:$0xff]   ;;  %v1161_v12 = vld [vmem:[%s1685_s6] ss:$0 sm:$0xff] }
  0x2f   :  { %1215 = vmatprep.subr.bf16.mxu1 %v1388_v29  ;;  %v1435_v29 = vld [vmem:[%s1684_s5 + $0x20] sm:$0xff]  }
  0x31   :  { %1194 = vmatpush3.bf16.msra.mxu0 %v1389_v30  ;;  %v1436_v30 = vld [vmem:[%s1684_s5 + $0x28] sm:$0xff]  }
  0x32   :  { %1216 = vmatpush3.bf16.msra.mxu1 %v1390_v31  ;;  %1223 = vmatprep.subr.bf16.mxu0 %v1391_v40 }
  0x33   :  { %1245 = vmatprep.subr.bf16.mxu1 %v1392_v41 }
  0x34   :  { %615 = vmatmul.mubr.bf16.vlgmr.msra.gmra.mrb[0].mxu0 %v184_v37 }
  0x35   :  { %655 = vmatmul.mubr.bf16.vlgmr.msra.gmra.mrb[0].mxu1 %v186_v39  ;;  %1224 = vmatpush3.bf16.msra.mxu0 %v1393_v42 }
  0x36   :  { %1246 = vmatpush3.bf16.msra.mxu1 %v1394_v43  ;;  %1225 = vmatprep.subr.bf16.mxu0 %v1395_v44 }
  0x37   :  { %1247 = vmatprep.subr.bf16.mxu1 %v1396_v45  ;;  %694 = vmatprep.mubr.bf16.mxu0 %v189_v10  ;;  %v1445_v10 = vld [vmem:[%s1686_s7 + $0x30] sm:$0xff]  }
  0x38   :  { %734 = vmatprep.mubr.bf16.mxu1 %v191_v11  ;;  %v1446_v11 = vld [vmem:[%s1686_s7 + $0x38] sm:$0xff]  }
  0x39   :  { %1226 = vmatpush3.bf16.msra.mxu0 %v1397_v46 }
  0x3a   :  { %1248 = vmatpush3.bf16.msra.mxu1 %v1398_v47  ;;  %1227 = vmatprep.subr.bf16.mxu0 %v1399_v48 }
  0x3b   :  { %1249 = vmatprep.subr.bf16.mxu1 %v1400_v49 }
  0x3d   :  { %1228 = vmatpush3.bf16.msra.mxu0 %v1401_v50 }
  0x3e   :  { %1250 = vmatpush3.bf16.msra.mxu1 %v1402_v51  ;;  %1229 = vmatprep.subr.bf16.mxu0 %v1403_v52 }
  0x3f   :  { %1251 = vmatprep.subr.bf16.mxu1 %v1404_v53 }
  0x41   :  { %1230 = vmatpush3.bf16.msra.mxu0 %v1405_v54 }
  0x42   :  { %1252 = vmatpush3.bf16.msra.mxu1 %v1406_v55  ;;  %1231 = vmatprep.subr.bf16.mxu0 %v1407_v56 }
  0x43   :  { %1253 = vmatprep.subr.bf16.mxu1 %v1408_v57 }
  0x45   :  { %1232 = vmatpush3.bf16.msra.mxu0 %v1409_v58  ;;  %v1437_v58 = vld [vmem:[%s1684_s5 + $0x30] sm:$0xff]  }
  0x46   :  { %1254 = vmatpush3.bf16.msra.mxu1 %v1410_v59  ;;  %1233 = vmatprep.subr.bf16.mxu0 %v1411_v60  ;;  %v1438_v59 = vld [vmem:[%s1684_s5 + $0x38] sm:$0xff]   ;;  %v1439_v60 = vld [vmem:[%s1686_s7] sm:$0xff]  }
  0x47   :  { %1255 = vmatprep.subr.bf16.mxu1 %v1412_v61  ;;  %v1440_v61 = vld [vmem:[%s1686_s7 + $0x8] sm:$0xff]  }
  0x49   :  { %1234 = vmatpush3.bf16.msra.mxu0 %v1413_v62  ;;  %v1441_v62 = vld [vmem:[%s1686_s7 + $0x10] sm:$0xff]  }
  0x4a   :  { %1256 = vmatpush3.bf16.msra.mxu1 %v1414_v63  ;;  %1235 = vmatprep.subr.bf16.mxu0 %v1415_v0  ;;  %v1442_v63 = vld [vmem:[%s1686_s7 + $0x18] sm:$0xff]   ;;  %v1443_v0 = vld [vmem:[%s1686_s7 + $0x20] sm:$0xff]  }
  0x4b   :  { %1257 = vmatprep.subr.bf16.mxu1 %v1416_v1  ;;  %v1444_v1 = vld [vmem:[%s1686_s7 + $0x28] sm:$0xff]  }
  0x4d   :  { %1236 = vmatpush3.bf16.msra.mxu0 %v1417_v2  ;;  %v1152_v2 = vld [vmem:[%s1683_s4] ss:$0 sm:$0xff] }
  0x4e   :  { %1258 = vmatpush3.bf16.msra.mxu1 %v1418_v3  ;;  %1237 = vmatprep.subr.bf16.mxu0 %v1419_v4 }
  0x4f   :  { %1259 = vmatprep.subr.bf16.mxu1 %v1420_v5 }
  0x51   :  { %1238 = vmatpush3.bf16.msra.mxu0 %v1421_v6 }
  0x52   :  { %1260 = vmatpush3.bf16.msra.mxu1 %v1422_v7  ;;  %1294 = vmatprep.subr.bf16.mxu0 %v1474_v17 }
  0x53   :  { %1314 = vmatprep.subr.bf16.mxu1 %v1474_v17 }
  0x54   :  { %695 = vmatmul.mubr.bf16.vlgmr.msra.gmra.mrb[4].mxu0 %v188_v14 }
  0x55   :  { %735 = vmatmul.mubr.bf16.vlgmr.msra.gmra.mrb[4].mxu1 %v190_v15  ;;  %1295 = vmatpush3.bf16.msra.mxu0 %v1423_v16 }
  0x56   :  { %1296 = vmatprep.subr.bf16.mxu0 %v1474_v17  ;;  %1310 = vmatprep.mubr.msk.bf16.mxu0 %vm1475_vm0, %v1474_v17 }
  0x57   :  { %1330 = vmatprep.mubr.msk.bf16.mxu1 %vm1475_vm0, %v1474_v17  ;;  %1315 = vmatpush3.bf16.msra.mxu1 %v1431_v25 }
  0x58   :  { %1316 = vmatprep.subr.bf16.mxu1 %v1474_v17 }
  0x59   :  { %1297 = vmatpush3.bf16.msra.mxu0 %v1424_v18 }
  0x5a   :  { %1298 = vmatprep.subr.bf16.mxu0 %v1474_v17 }
  0x5b   :  { %1317 = vmatpush3.bf16.msra.mxu1 %v1432_v26 }
  0x5c   :  { %1318 = vmatprep.subr.bf16.mxu1 %v1474_v17 }
  0x5d   :  { %1299 = vmatpush3.bf16.msra.mxu0 %v1425_v19 }
  0x5e   :  { %1300 = vmatprep.subr.bf16.mxu0 %v1474_v17 }
  0x5f   :  { %1319 = vmatpush3.bf16.msra.mxu1 %v1433_v27 }
  0x60   :  { %1320 = vmatprep.subr.bf16.mxu1 %v1474_v17 }
  0x61   :  { %1301 = vmatpush3.bf16.msra.mxu0 %v1426_v20 }
  0x62   :  { %1302 = vmatprep.subr.bf16.mxu0 %v1474_v17 }
  0x63   :  { %1321 = vmatpush3.bf16.msra.mxu1 %v1434_v28 }
  0x64   :  { %1322 = vmatprep.subr.bf16.mxu1 %v1474_v17 }
  0x65   :  { %1303 = vmatpush3.bf16.msra.mxu0 %v1427_v21 }
  0x66   :  { %1304 = vmatprep.subr.bf16.mxu0 %v1474_v17 }
  0x67   :  { %1323 = vmatpush3.bf16.msra.mxu1 %v1435_v29 }
  0x68   :  { %1324 = vmatprep.subr.bf16.mxu1 %v1474_v17 }
  0x69   :  { %1305 = vmatpush3.bf16.msra.mxu0 %v1428_v22 }
  0x6a   :  { %1306 = vmatprep.subr.bf16.mxu0 %v1474_v17 }
  0x6b   :  { %1325 = vmatpush3.bf16.msra.mxu1 %v1436_v30 }
  0x6c   :  { %1326 = vmatprep.subr.bf16.mxu1 %v1474_v17 }
  0x6d   :  { %1307 = vmatpush3.bf16.msra.mxu0 %v1429_v23 }
  0x6e   :  { %1308 = vmatprep.subr.bf16.mxu0 %v1474_v17 }
  0x6f   :  { %1327 = vmatpush3.bf16.msra.mxu1 %v1437_v58 }
  0x70   :  { %1328 = vmatprep.subr.bf16.mxu1 %v1474_v17 }
  0x71   :  { %1309 = vmatpush3.bf16.msra.mxu0 %v1430_v24 }
  0x72   :  { %1334 = vmatprep.subr.bf16.mxu0 %v1474_v17 }
  0x73   :  { %1329 = vmatpush3.bf16.msra.mxu1 %v1438_v59 }
 0x107   :  { %v1195_v31 = vpop.f32.mrb[0].mxu0 }
 0x108   :  { %v1217_v32 = vpop.f32.mrb[0].mxu1  ;;  %v1196_v34 = vpop.f32.mrb[1].mxu0 }
 0x109   :  { %v1218_v35 = vpop.f32.mrb[1].mxu1  ;;  %v1197_v36 = vadd.f32 %v1196_v34, %v1195_v31  ;;  %v1198_v38 = vpop.f32.mrb[2].mxu0 }
 0x10a   :  { %v1219_v37 = vadd.f32 %v1218_v35, %v1217_v32  ;;  %v1220_v39 = vpop.f32.mrb[2].mxu1  ;;  %v1199_v40 = vpop.f32.mrb[3].mxu0 }
 0x10b   :  { %v1221_v41 = vpop.f32.mrb[3].mxu1  ;;  %v617_v42 = vadd.f32 %v1197_v36, %v1087_v33 }
 0x10d   :  { %v657_v43 = vadd.f32 %v1219_v37, %v617_v42 }
 0x127   :  { %v1239_v44 = vpop.f32.mrb[4].mxu0 }
 0x128   :  { %v1261_v45 = vpop.f32.mrb[4].mxu1  ;;  %v1240_v46 = vpop.f32.mrb[5].mxu0 }
 0x129   :  { %v1241_v47 = vadd.f32 %v1240_v46, %v1239_v44  ;;  %v1262_v48 = vpop.f32.mrb[5].mxu1  ;;  %v1242_v49 = vpop.f32.mrb[6].mxu0 }
 0x12a   :  { %v1263_v50 = vadd.f32 %v1262_v48, %v1261_v45  ;;  %v1264_v51 = vpop.f32.mrb[6].mxu1  ;;  %v1243_v52 = vpop.f32.mrb[7].mxu0 }
 0x12b   :  { %v697_v53 = vadd.f32 %v1241_v47, %v657_v43  ;;  %v1265_v54 = vpop.f32.mrb[7].mxu1 }
 0x12d   :  { %v737_v55 = vadd.f32 %v1263_v50, %v697_v53 }
 0x12f   :  { %v742_v56 = vmax.f32 %v737_v55, 0.0 }
 0x131   :  { %v760_v57 = vpack.c.bf16 %v742_v56, %v742_v56 }
 0x133   :  { %1311 = vmatmul.mubr.bf16.vlgmr.msra.gmra.mrb[8].mxu0 %v760_v57 }
 0x134   :  { %1350 = vmatprep.mubr.msk.bf16.mxu0 %vm1475_vm0, %v1474_v17  ;;  %1335 = vmatpush3.bf16.msra.mxu0 %v1439_v60 }
 0x135   :  { %1336 = vmatprep.subr.bf16.mxu0 %v1474_v17 }
 0x138   :  { %1337 = vmatpush3.bf16.msra.mxu0 %v1440_v61 }
 0x139   :  { %1338 = vmatprep.subr.bf16.mxu0 %v1474_v17 }
 0x13c   :  { %1339 = vmatpush3.bf16.msra.mxu0 %v1441_v62 }
 0x13d   :  { %1340 = vmatprep.subr.bf16.mxu0 %v1474_v17 }
 0x140   :  { %1341 = vmatpush3.bf16.msra.mxu0 %v1442_v63 }
 0x141   :  { %1342 = vmatprep.subr.bf16.mxu0 %v1474_v17 }
 0x144   :  { %1343 = vmatpush3.bf16.msra.mxu0 %v1443_v0 }
 0x145   :  { %1344 = vmatprep.subr.bf16.mxu0 %v1474_v17 }
 0x148   :  { %1345 = vmatpush3.bf16.msra.mxu0 %v1444_v1 }
 0x149   :  { %1346 = vmatprep.subr.bf16.mxu0 %v1474_v17 }
 0x14c   :  { %1347 = vmatpush3.bf16.msra.mxu0 %v1445_v10 }
 0x14d   :  { %1348 = vmatprep.subr.bf16.mxu0 %v1474_v17  ;;  %v1170_v17 = vld [vmem:[%s1687_s8] ss:$0 sm:$0xff] }
 0x150   :  { %1349 = vmatpush3.bf16.msra.mxu0 %v1446_v11 }
 0x206   :  { %v849_v3 = vpop.f32.mrb[8].mxu0 }
 0x207   :  { %v850_v4 = vadd.f32 %v1152_v2, %v849_v3  ;;  %v1312_v5 = vpop.f32.mrb[9].mxu0 }
 0x208   :  { %v852_v6 = vpop.f32.mrb[10].mxu0 }
 0x209   :  { %v855_v7 = vmax.f32 %v850_v4, 0.0  ;;  %v1313_v8 = vpop.f32.mrb[11].mxu0 }
 0x20b   :  { %v873_v9 = vpack.c.bf16 %v855_v7, %v855_v7 }
 0x20d   :  { %1331 = vmatmul.mubr.bf16.vlgmr.msra.gmra.mrb[8].mxu1 %v873_v9 }
 0x2e0   :  { %v962_v13 = vpop.f32.mrb[8].mxu1 }
 0x2e1   :  { %v963_v14 = vadd.f32 %v1161_v12, %v962_v13  ;;  %v1332_v15 = vpop.f32.mrb[9].mxu1 }
 0x2e2   :  { %v965_v16 = vpop.f32.mrb[10].mxu1 }
 0x2e3   :  { %v968_v18 = vmax.f32 %v963_v14, 0.0  ;;  %v1333_v19 = vpop.f32.mrb[11].mxu1 }
 0x2e5   :  { %v986_v20 = vpack.c.bf16 %v968_v18, %v968_v18 }
 0x2e7   :  { %1351 = vmatmul.mubr.bf16.vlgmr.msra.gmra.mrb[12].mxu0 %v986_v20 }
 0x3ba   :  { %v1075_v21 = vpop.f32.mrb[12].mxu0 }
 0x3bb   :  { %v1076_v22 = vadd.f32 %v1170_v17, %v1075_v21  ;;  %v1352_v23 = vpop.f32.mrb[13].mxu0 }
 0x3bc   :  { %v1078_v24 = vpop.f32.mrb[14].mxu0 }
 0x3bd   :  { %1081 = vst [vmem:[%s1688_s9] sm:$0xff] %v1076_v22  ;;  %v1353_v25 = vpop.f32.mrb[15].mxu0 }
 0x3be   :  { %1086 = vsyncpa [#allocation3], 1 }

</bundles_post_ra>
